<compile_context>
chip_gen: v5e
topology: v5e:2x2
jax: 0.10.0
libtpu: 0.0.40
codegen_flags: <defaults>
</compile_context>

<pallas_src>
import functools

import jax
import jax.numpy as jnp
import numpy as np
from jax.experimental import pallas as pl
from jax.experimental.pallas import tpu as pltpu

_MIB = 1024 * 1024


def _gram_loss_kernel(s_ref, t_ref, o_ref, acc_ref, *, total_rows, block_rows,
                      tiles_per_split, needs_mask):
    i = pl.program_id(1)  # reduction (batch-tile) axis

    @pl.when(i == 0)
    def _init():
        acc_ref[...] = jnp.zeros_like(acc_ref)

    s = s_ref[...].astype(jnp.float32)
    t = t_ref[...].astype(jnp.float32)

    # F.normalize(x, p=2, dim=1) == x / max(||x||_2, 1e-12).
    # Clamp the sum-of-squares at eps**2 (identical) and use rsqrt (EUP slot).
    eps_sq = jnp.float32(1e-24)
    ss = jnp.sum(s * s, axis=1, keepdims=True)        # (tb, 1) lane reductions
    tt = jnp.sum(t * t, axis=1, keepdims=True)
    st = jnp.sum(s * t, axis=1, keepdims=True)
    s_inv = jax.lax.rsqrt(jnp.maximum(ss, eps_sq))
    t_inv = jax.lax.rsqrt(jnp.maximum(tt, eps_sq))

    # Per-row squared-error sum via the cosine-similarity identity (exact,
    # including the eps clamp):
    #   sum_j (t*t_inv - s*s_inv)^2 = tt*t_inv^2 + ss*s_inv^2 - 2*st*t_inv*s_inv
    row = tt * (t_inv * t_inv) + ss * (s_inv * s_inv) - 2.0 * st * (t_inv * s_inv)

    if needs_mask:
        # Mask rows that are padding (ragged last tile) or belong to a
        # duplicated, clamped over-range block of the core split.  Keep this a
        # select so garbage/NaN padding is discarded, not multiplied.
        c = pl.program_id(0)
        blk = c * tiles_per_split + i          # logical (unclamped) block index
        row0 = blk * block_rows
        row_ids = row0 + jax.lax.broadcasted_iota(jnp.int32, row.shape, 0)
        row = jnp.where(row_ids < total_rows, row, jnp.float32(0.0))

    acc_ref[...] += row                        # deferred sublane collapse

    @pl.when(i == pl.num_programs(1) - 1)
    def _finalize():
        o_ref[...] = jnp.sum(acc_ref[...], keepdims=True)


def _tpu_vmem_and_cores():
    """Best-effort (VMEM capacity in bytes, has-two-TensorCores) for this chip."""
    kind = ""
    try:
        kind = str(getattr(jax.devices()[0], "device_kind", "")).lower()
    except Exception:
        pass
    two_tc = "v7" in kind                      # v7x: 2 TensorCores per chip
    vmem_cap = None
    try:
        vmem_cap = getattr(pltpu.get_tpu_info(), "vmem_capacity_bytes", None)
    except Exception:
        vmem_cap = None
    if not vmem_cap:
        vmem_cap = (64 if two_tc else 128) * _MIB
    vmem_cap = int(vmem_cap)
    if two_tc:
        vmem_cap = min(vmem_cap, 64 * _MIB)    # budget per TensorCore on v7x
    return vmem_cap, two_tc


def gram_loss(student, teacher, *, pipeline_buffers=2):
    """Pallas implementation of Gram_loss.forward (returns a scalar f32)."""
    student = jnp.asarray(student)
    teacher = jnp.asarray(teacher)
    if not jnp.issubdtype(student.dtype, jnp.floating):
        student = student.astype(jnp.float32)
    if not jnp.issubdtype(teacher.dtype, jnp.floating):
        teacher = teacher.astype(jnp.float32)
    assert student.shape == teacher.shape and student.ndim == 2

    B, D = student.shape
    itemsize = max(student.dtype.itemsize, teacher.dtype.itemsize)

    vmem_cap, two_tc = _tpu_vmem_and_cores()

    # Row-tile size: 2 inputs x pipeline_buffers of the source dtype plus ~4
    # full-tile f32 temporaries (upcasts + products) must fit in a fraction of
    # VMEM with headroom.  Per-grid-step overhead is ~0.35 us, so bigger tiles
    # (up to 2048 rows) keep the kernel on the HBM roofline, especially on v7x.
    budget = min(int(vmem_cap * 0.55), 48 * _MIB)
    per_row_bytes = 2 * pipeline_buffers * D * itemsize + 4 * D * 4
    max_rows = max(8, budget // per_row_bytes)
    tb = max(8, min(2048, (max_rows // 8) * 8))
    if tb >= B:
        tb = B                                  # single full-extent block

    nblocks = -(-B // tb)
    num_splits = 2 if (two_tc and nblocks >= 2) else 1   # 2-way split only on v7x
    tps = -(-nblocks // num_splits)             # tiles handled per split
    needs_mask = (nblocks * tb != B) or (num_splits * tps != nblocks)
    last_block = nblocks - 1

    if num_splits * tps > nblocks:
        def in_map(c, i):
            # Clamp over-range blocks onto the last valid block; their rows are
            # masked out inside the kernel.
            return (jnp.minimum(c * tps + i, last_block), 0)
    else:
        def in_map(c, i):
            return (c * tps + i, 0)

    bs_kwargs = {}
    if pipeline_buffers != 2:
        # Optional deeper pipelining knob; keep only if xprof shows exposed DMA.
        bs_kwargs["pipeline_mode"] = pl.Buffered(pipeline_buffers)
    in_spec = pl.BlockSpec((tb, D), in_map, **bs_kwargs)

    # Explicit scoped-VMEM limit covering the pipelined input buffers, the f32
    # working set and the lane-padded (tb, 1) accumulator, with headroom.
    pipeline_bytes = 2 * pipeline_buffers * tb * D * itemsize
    temp_bytes = 4 * tb * D * 4
    acc_bytes = tb * 128 * 4
    need = pipeline_bytes + temp_bytes + acc_bytes + 4 * _MIB
    vmem_limit = int(min(vmem_cap - 8 * _MIB, max(need, 32 * _MIB)))
    vmem_limit = max(vmem_limit, 16 * _MIB)

    kernel = functools.partial(
        _gram_loss_kernel,
        total_rows=B,
        block_rows=tb,
        tiles_per_split=tps,
        needs_mask=needs_mask,
    )

    cost = pl.CostEstimate(
        flops=6 * B * D + 12 * B,
        transcendentals=2 * B,
        bytes_accessed=B * D * (student.dtype.itemsize + teacher.dtype.itemsize)
        + num_splits * 4,
    )

    def build(leading_sem):
        return pl.pallas_call(
            kernel,
            out_shape=jax.ShapeDtypeStruct((num_splits, 1), jnp.float32),
            grid_spec=pltpu.PrefetchScalarGridSpec(
                num_scalar_prefetch=0,
                grid=(num_splits, tps),
                in_specs=[in_spec, in_spec],
                out_specs=pl.BlockSpec((1, 1), lambda c, i: (c, 0)),
                scratch_shapes=[pltpu.VMEM((tb, 1), jnp.float32)],
            ),
            compiler_params=pltpu.CompilerParams(
                dimension_semantics=(leading_sem, pltpu.ARBITRARY),
                vmem_limit_bytes=vmem_limit,
            ),
            cost_estimate=cost,
        )

    if num_splits == 2:
        # Only core-level semantics are guaranteed to shard the leading axis
        # across the two v7x TensorCores; fall back to "parallel" if the
        # installed JAX rejects CORE_PARALLEL for this pallas_call.
        try:
            partials = build(pltpu.CORE_PARALLEL)(student, teacher)
        except Exception:
            partials = build(pltpu.PARALLEL)(student, teacher)
    else:
        partials = build(pltpu.ARBITRARY)(student, teacher)

    # Combine per-core partial sums and normalize by the true element count.
    return jnp.sum(partials) / jnp.float32(B * D)


def _gram_loss_ref(student, teacher):
    """Pure-JAX reference for correctness checking."""
    s = jnp.asarray(student, jnp.float32)
    t = jnp.asarray(teacher, jnp.float32)
    eps = 1e-12
    ns = s / jnp.maximum(jnp.linalg.norm(s, axis=1, keepdims=True), eps)
    nt = t / jnp.maximum(jnp.linalg.norm(t, axis=1, keepdims=True), eps)
    return jnp.mean((nt - ns) ** 2)


if __name__ == "__main__":
    key = jax.random.PRNGKey(0)
    k1, k2, k3, k4 = jax.random.split(key, 4)

    # Small shape implied by the forward: [batch, hidden] feature matrices.
    B, D = 16, 32
    student = jax.random.normal(k1, (B, D), dtype=jnp.float32)
    teacher = jax.random.normal(k2, (B, D), dtype=jnp.float32)
    loss = gram_loss(student, teacher)
    jax.block_until_ready(loss)
    ref = _gram_loss_ref(student, teacher)
    assert np.allclose(np.asarray(loss), np.asarray(ref), rtol=1e-5, atol=1e-6), (loss, ref)

    # Larger ragged case exercising the tiled/accumulator path:
    # multiple 2048-row tiles with a masked ragged last tile
    # (and the 2-way core split on 2-TC chips).
    B2, D2 = 2080, 256
    s2 = jax.random.normal(k3, (B2, D2), dtype=jnp.float32)
    t2 = jax.random.normal(k4, (B2, D2), dtype=jnp.float32)
    loss2 = gram_loss(s2, t2)
    jax.block_until_ready(loss2)
    ref2 = _gram_loss_ref(s2, t2)
    assert np.allclose(np.asarray(loss2), np.asarray(ref2), rtol=2e-5, atol=1e-6), (loss2, ref2)

    print("KERNEL_OK")
</pallas_src>

<mosaic_0001>
module attributes {stable_mosaic.version = 11 : i64} {
  func.func @_gram_loss_kernel(%arg0: i32, %arg1: i32, %arg2: memref<16x32xf32, #tpu.memory_space<vmem>>, %arg3: memref<16x32xf32, #tpu.memory_space<vmem>>, %arg4: memref<1x1xf32, #tpu.memory_space<vmem>>, %arg5: memref<16x1xf32, #tpu.memory_space<vmem>>) attributes {dimension_semantics = [#tpu.dimension_semantics<arbitrary>, #tpu.dimension_semantics<arbitrary>], iteration_bounds = array<i64: 1, 1>, scalar_prefetch = 0 : i64, scratch_operands = 1 : i64, tpu.core_type = #tpu.core_type<tc>, window_params = [{transform_indices = @transform_0, window_bounds = array<i64: 16, 32>}, {transform_indices = @transform_1, window_bounds = array<i64: 16, 32>}, {transform_indices = @transform_2, window_bounds = array<i64: 1, 1>}]} {
    %c0_i32 = arith.constant 0 : i32
    %0 = arith.cmpi eq, %arg1, %c0_i32 : i32
    %1 = arith.extui %0 : i1 to i32
    %c0_i32_0 = arith.constant 0 : i32
    %2 = arith.cmpi ne, %1, %c0_i32_0 : i32
    scf.if %2 {
      %cst_15 = arith.constant 0.000000e+00 : f32
      %36 = vector.broadcast %cst_15 : f32 to vector<16x1xf32>
      %c0_16 = arith.constant 0 : index
      %c0_17 = arith.constant 0 : index
      %37 = vector.load %arg5[%c0_16, %c0_17] : memref<16x1xf32, #tpu.memory_space<vmem>>, vector<16x1xf32>
      tpu.vector_store %arg5[%c0_16, %c0_17], %36 {strides = array<i32>} : memref<16x1xf32, #tpu.memory_space<vmem>>, vector<16x1xf32>,
    } else {
    }
    %c0 = arith.constant 0 : index
    %c0_1 = arith.constant 0 : index
    %3 = vector.load %arg2[%c0, %c0_1] : memref<16x32xf32, #tpu.memory_space<vmem>>, vector<16x32xf32>
    %c0_2 = arith.constant 0 : index
    %c0_3 = arith.constant 0 : index
    %4 = vector.load %arg3[%c0_2, %c0_3] : memref<16x32xf32, #tpu.memory_space<vmem>>, vector<16x32xf32>
    %5 = arith.mulf %3, %3 : vector<16x32xf32>
    %cst = arith.constant dense<0.000000e+00> : vector<16xf32>
    %6 = vector.multi_reduction <add>, %5, %cst [1] : vector<16x32xf32> to vector<16xf32>
    %7 = vector.shape_cast %6 : vector<16xf32> to vector<16x1xf32>
    %8 = arith.mulf %4, %4 : vector<16x32xf32>
    %cst_4 = arith.constant dense<0.000000e+00> : vector<16xf32>
    %9 = vector.multi_reduction <add>, %8, %cst_4 [1] : vector<16x32xf32> to vector<16xf32>
    %10 = vector.shape_cast %9 : vector<16xf32> to vector<16x1xf32>
    %11 = arith.mulf %3, %4 : vector<16x32xf32>
    %cst_5 = arith.constant dense<0.000000e+00> : vector<16xf32>
    %12 = vector.multi_reduction <add>, %11, %cst_5 [1] : vector<16x32xf32> to vector<16xf32>
    %13 = vector.shape_cast %12 : vector<16xf32> to vector<16x1xf32>
    %cst_6 = arith.constant 1.000000e-24 : f32
    %14 = vector.broadcast %cst_6 : f32 to vector<16x1xf32>
    %15 = arith.maximumf %7, %14 : vector<16x1xf32>
    %16 = math.rsqrt %15 : vector<16x1xf32>
    %cst_7 = arith.constant 1.000000e-24 : f32
    %17 = vector.broadcast %cst_7 : f32 to vector<16x1xf32>
    %18 = arith.maximumf %10, %17 : vector<16x1xf32>
    %19 = math.rsqrt %18 : vector<16x1xf32>
    %20 = arith.mulf %19, %19 : vector<16x1xf32>
    %21 = arith.mulf %10, %20 : vector<16x1xf32>
    %22 = arith.mulf %16, %16 : vector<16x1xf32>
    %23 = arith.mulf %7, %22 : vector<16x1xf32>
    %24 = arith.addf %21, %23 : vector<16x1xf32>
    %cst_8 = arith.constant 2.000000e+00 : f32
    %25 = vector.broadcast %cst_8 : f32 to vector<16x1xf32>
    %26 = arith.mulf %25, %13 : vector<16x1xf32>
    %27 = arith.mulf %19, %16 : vector<16x1xf32>
    %28 = arith.mulf %26, %27 : vector<16x1xf32>
    %29 = arith.subf %24, %28 : vector<16x1xf32>
    %c0_9 = arith.constant 0 : index
    %c0_10 = arith.constant 0 : index
    %30 = vector.load %arg5[%c0_9, %c0_10] : memref<16x1xf32, #tpu.memory_space<vmem>>, vector<16x1xf32>
    %31 = arith.addf %30, %29 : vector<16x1xf32>
    %c0_11 = arith.constant 0 : index
    %c0_12 = arith.constant 0 : index
    %32 = vector.load %arg5[%c0_11, %c0_12] : memref<16x1xf32, #tpu.memory_space<vmem>>, vector<16x1xf32>
    tpu.vector_store %arg5[%c0_11, %c0_12], %31 {strides = array<i32>} : memref<16x1xf32, #tpu.memory_space<vmem>>, vector<16x1xf32>,
    %c0_i32_13 = arith.constant 0 : i32
    %33 = arith.cmpi eq, %arg1, %c0_i32_13 : i32
    %34 = arith.extui %33 : i1 to i32
    %c0_i32_14 = arith.constant 0 : i32
    %35 = arith.cmpi ne, %34, %c0_i32_14 : i32
    scf.if %35 {
      %c0_15 = arith.constant 0 : index
      %c0_16 = arith.constant 0 : index
      %36 = vector.load %arg5[%c0_15, %c0_16] : memref<16x1xf32, #tpu.memory_space<vmem>>, vector<16x1xf32>
      %37 = vector.shape_cast %36 : vector<16x1xf32> to vector<1x16x1xf32>
      %cst_17 = arith.constant dense<0.000000e+00> : vector<1xf32>
      %38 = vector.multi_reduction <add>, %37, %cst_17 [1, 2] : vector<1x16x1xf32> to vector<1xf32>
      %39 = vector.shape_cast %38 : vector<1xf32> to vector<1x1x1xf32>
      %40 = vector.extract %39[0, 0, 0] : f32 from vector<1x1x1xf32>
      %41 = vector.broadcast %40 : f32 to vector<1x1xf32>
      %c0_18 = arith.constant 0 : index
      %c0_19 = arith.constant 0 : index
      %42 = vector.load %arg4[%c0_18, %c0_19] : memref<1x1xf32, #tpu.memory_space<vmem>>, vector<1x1xf32>
      tpu.vector_store %arg4[%c0_18, %c0_19], %41 {strides = array<i32>} : memref<1x1xf32, #tpu.memory_space<vmem>>, vector<1x1xf32>,
    } else {
    }
    return
  }
  func.func @transform_0(%arg0: i32, %arg1: i32) -> (i32, i32) {
    %c1_i32 = arith.constant 1 : i32
    %0 = arith.muli %arg0, %c1_i32 : i32
    %1 = arith.addi %0, %arg1 : i32
    %c0_i32 = arith.constant 0 : i32
    %c0_i32_0 = arith.constant 0 : i32
    return %1, %c0_i32 : i32, i32
  }
  func.func @transform_1(%arg0: i32, %arg1: i32) -> (i32, i32) {
    %c1_i32 = arith.constant 1 : i32
    %0 = arith.muli %arg0, %c1_i32 : i32
    %1 = arith.addi %0, %arg1 : i32
    %c0_i32 = arith.constant 0 : i32
    %c0_i32_0 = arith.constant 0 : i32
    return %1, %c0_i32 : i32, i32
  }
  func.func @transform_2(%arg0: i32, %arg1: i32) -> (i32, i32) {
    %c0_i32 = arith.constant 0 : i32
    %c0_i32_0 = arith.constant 0 : i32
    return %arg0, %c0_i32 : i32, i32
  }
}

</mosaic_0001>

<bundles_post_ra>
// kernel: tpu_custom_call.1
= control target key start
LH: loop header
LB: loop body
LE: loop exit
PB: predicated region body
PF: predicated region fallthrough
CT: control target
= control target key end

     0   :  { %7 = vsyncpa [#allocation4], 0  ;;  %s343_s0 = inlined_call_operand.hbm [shape: f32[16,32], index: 0, kind: input, shape index: {}]   ;;  %s344_s1 = inlined_call_operand.hbm [shape: f32[16,32], index: 1, kind: input, shape index: {}]   ;;  %s345_s2 = inlined_call_operand.hbm [shape: f32[1,1], index: 2, kind: output, shape index: {}]  }
   0x1   :  { %8 = vsyncpa [#allocation7], 0 }
   0x2   :  { %9 = vsyncpa [#allocation5], 0  ;;  %s18_s11 = sshll.u32 %s343_s0, 4  ;;  %s293_s12 = smov [#allocation3]   ;;  %s19_s11 = int_to_ptr.hbm [resolvable:$true] %s18_s11 }
   0x3   :  { %s20_s13 = sshll.u32 %s293_s12, 4  ;;  %s35_s16 = sshll.u32 %s344_s1, 4  ;;  %s21_s13 = int_to_ptr.vmem [resolvable:$true] %s20_s13  ;;  %s36_s16 = int_to_ptr.hbm [resolvable:$true] %s35_s16 }
   0x4   :  { %s294_s17 = smov 128   ;;  %s295_s18 = smov 8  }
   0x5   :  { %26 = dma.hbm_to_vmem [thread:$0]  %s19_s11, 256, %s21_s13, [#allocation4], %s294_s17, %s294_s17, %s295_s18  }
   0x6   :  { %s296_s19 = smov [#allocation6]  }
   0x7   :  { %s37_s20 = sshll.u32 %s296_s19, 4  ;;  %s38_s20 = int_to_ptr.vmem [resolvable:$true] %s37_s20 }
   0x8   :  { %43 = dma.hbm_to_vmem [thread:$0]  %s36_s16, 256, %s38_s20, [#allocation7], %s294_s17, %s294_s17, %s295_s18  }
   0x9   :  { %287 = dma.done.wait [#allocation4], 256  }
   0xa   :  { %288 = vsyncadd [#allocation4], 4294967040 }
   0xb   :  { %289 = dma.done.wait [#allocation7], 256  }
   0xc   :  { %290 = vsyncadd [#allocation7], 4294967040  ;;  %v65_v0 = vld [vmem:[#allocation6] sm:$0xff]  ;;  %vm69_vm0 = vcmask 261120   ;;  %v63_v1 = vld [vmem:[#allocation3] sm:$0xff]  ;;  %vm60_vm1 = vcmask 7168  }
   0xd   :  { %v76_v2 = vmul.f32 %v65_v0, %v65_v0  ;;  %v67_v3 = vmul.f32 %v63_v1, %v63_v1  ;;  %v84_v4 = vmul.f32 %v65_v0, %v63_v1  ;;  %v66_v5 = vld [vmem:[#allocation6 + $0x8] sm:$0xff]  ;;  %v64_v6 = vld [vmem:[#allocation3 + $0x8] sm:$0xff]  ;;  %v297_v16 = vmov 0.0   ;;  %s298_s0 = smov [#allocation8]   ;;  %s188_s23 = sshll.u32 %s345_s2, 4  ;;  %s189_s23 = int_to_ptr.hbm [resolvable:$true] %s188_s23 }
   0xe   :  { %v77_v10 = vmul.f32 %v66_v5, %v66_v5  ;;  %v68_v11 = vmul.f32 %v64_v6, %v64_v6  ;;  %v85_v12 = vmul.f32 %v66_v5, %v64_v6  ;;  %61 = vst.msk [vmem:[#allocation2] sm:$0xff] %vm60_vm1, %v297_v16  ;;  %s186_s1 = sshll.u32 %s298_s0, 4  ;;  %vm179_vm14 = vcmask 0   ;;  %s187_s1 = int_to_ptr.vmem [resolvable:$true] %s186_s1 }
   0xf   :  { %v78_v7 = vsel %vm69_vm0, %v76_v2, 0.0  ;;  %v70_v8 = vsel %vm69_vm0, %v67_v3, 0.0  ;;  %v86_v9 = vsel %vm69_vm0, %v84_v4, 0.0  ;;  %62 = vst.msk [vmem:[#allocation2 + $0x8] sm:$0xff] %vm60_vm1, %v297_v16 }
  0x10   :  { %79 = vadd.xlane.f32.xlu1 %v78_v7  ;;  %71 = vadd.xlane.f32.xlu0 %v70_v8  ;;  %v81_v13 = vsel %vm69_vm0, %v77_v10, 0.0  ;;  %v73_v14 = vsel %vm69_vm0, %v68_v11, 0.0  ;;  %v89_v15 = vsel %vm69_vm0, %v85_v12, 0.0 }
  0x11   :  { %87 = vadd.xlane.f32.xlu2 %v86_v9 }
  0x15   :  { %v154_v60 = vld [vmem:[#allocation2] sm:$0xff] }
  0x16   :  { %v155_v10 = vld [vmem:[#allocation2 + $0x8] sm:$0xff] }
  0x18   :  { %82 = vadd.xlane.f32.xlu1 %v81_v13  ;;  %74 = vadd.xlane.f32.xlu0 %v73_v14 }
  0x19   :  { %90 = vadd.xlane.f32.xlu2 %v89_v15 }
  0x83   :  { %v80_v17 = vpop.xlane.xlu1 %79  ;;  %v72_v18 = vpop.xlane.xlu0 %71 }
  0x84   :  { %v114_v19 = vmax.f32 %v80_v17, 1e-24  ;;  %v92_v20 = vmax.f32 %v72_v18, 1e-24  ;;  %v88_v36 = vpop.xlane.xlu2 %87 }
  0x85   :  { %v146_v49 = vmul.f32 2.0, %v88_v36 }
  0x86   :  { %207 = vrsqrt.f32 %v114_v19  ;;  %vm122_vm4 = vweird.f32 %v114_v19  ;;  %vm100_vm6 = vweird.f32 %v92_v20 }
  0x87   :  { %209 = vrsqrt.f32 %v92_v20 }
  0x8b   :  { %v328_v21 = vpop.xlane.xlu1 %82  ;;  %v330_v22 = vpop.xlane.xlu0 %74 }
  0x8c   :  { %v208_v23 = vpop.eup %207  ;;  %v115_v24 = vmax.f32 %v328_v21, 1e-24  ;;  %v93_v25 = vmax.f32 %v330_v22, 1e-24  ;;  %v91_v61 = vpop.xlane.xlu2 %90 }
  0x8d   :  { %v210_v26 = vpop.eup %209  ;;  %v117_v27 = vmul.f32 %v208_v23, %v114_v19  ;;  %vm123_vm2 = vweird.f32 %v208_v23  ;;  %v147_v4 = vmul.f32 2.0, %v91_v61 }
  0x8e   :  { %v95_v28 = vmul.f32 %v210_v26, %v92_v20  ;;  %211 = vrsqrt.f32 %v115_v24  ;;  %vm101_vm3 = vweird.f32 %v210_v26  ;;  %vm124_vm5 = vmor %vm122_vm4, %vm123_vm2  ;;  %vm132_vm10 = vweird.f32 %v115_v24 }
  0x8f   :  { %v118_v29 = vmul.f32 %v208_v23, %v117_v27  ;;  %213 = vrsqrt.f32 %v93_v25  ;;  %vm102_vm7 = vmor %vm100_vm6, %vm101_vm3  ;;  %vm110_vm12 = vweird.f32 %v93_v25 }
  0x90   :  { %v96_v30 = vmul.f32 %v210_v26, %v95_v28 }
  0x91   :  { %v119_v31 = vmul.f32 0.5, %v118_v29 }
  0x92   :  { %v97_v32 = vmul.f32 0.5, %v96_v30 }
  0x93   :  { %v120_v33 = vsub.f32 1.5, %v119_v31 }
  0x94   :  { %v212_v34 = vpop.eup %211  ;;  %v98_v35 = vsub.f32 1.5, %v97_v32 }
  0x95   :  { %v214_v37 = vpop.eup %213  ;;  %v121_v38 = vmul.f32 %v208_v23, %v120_v33  ;;  %v127_v39 = vmul.f32 %v212_v34, %v115_v24  ;;  %vm133_vm8 = vweird.f32 %v212_v34 }
  0x96   :  { %v99_v40 = vmul.f32 %v210_v26, %v98_v35  ;;  %v105_v41 = vmul.f32 %v214_v37, %v93_v25  ;;  %vm111_vm9 = vweird.f32 %v214_v37  ;;  %vm134_vm11 = vmor %vm132_vm10, %vm133_vm8 }
  0x97   :  { %v125_v42 = vsel %vm124_vm5, %v208_v23, %v121_v38  ;;  %v128_v43 = vmul.f32 %v212_v34, %v127_v39  ;;  %vm112_vm13 = vmor %vm110_vm12, %vm111_vm9 }
  0x98   :  { %v136_v44 = vmul.f32 %v125_v42, %v125_v42  ;;  %v103_v45 = vsel %vm102_vm7, %v210_v26, %v99_v40  ;;  %v106_v46 = vmul.f32 %v214_v37, %v105_v41 }
  0x99   :  { %v140_v47 = vmul.f32 %v103_v45, %v103_v45  ;;  %v129_v48 = vmul.f32 0.5, %v128_v43  ;;  %v148_v50 = vmul.f32 %v125_v42, %v103_v45 }
  0x9a   :  { %v138_v51 = vmul.f32 %v136_v44, %v80_v17  ;;  %v107_v52 = vmul.f32 0.5, %v106_v46 }
  0x9b   :  { %v142_v53 = vmul.f32 %v140_v47, %v72_v18  ;;  %v130_v54 = vsub.f32 1.5, %v129_v48  ;;  %v150_v58 = vmul.f32 %v148_v50, %v146_v49 }
  0x9c   :  { %v108_v55 = vsub.f32 1.5, %v107_v52 }
  0x9d   :  { %v144_v56 = vadd.f32 %v142_v53, %v138_v51  ;;  %v131_v57 = vmul.f32 %v212_v34, %v130_v54 }
  0x9e   :  { %v109_v59 = vmul.f32 %v214_v37, %v108_v55 }
  0x9f   :  { %v135_v62 = vsel %vm134_vm11, %v212_v34, %v131_v57  ;;  %v152_v63 = vsub.f32 %v144_v56, %v150_v58 }
  0xa0   :  { %v137_v0 = vmul.f32 %v135_v62, %v135_v62  ;;  %v113_v1 = vsel %vm112_vm13, %v214_v37, %v109_v59 }
  0xa1   :  { %v141_v2 = vmul.f32 %v113_v1, %v113_v1  ;;  %v156_v3 = vadd.f32 %v154_v60, %v152_v63  ;;  %v149_v5 = vmul.f32 %v135_v62, %v113_v1 }
  0xa2   :  { %v139_v6 = vmul.f32 %v137_v0, %v328_v21 }
  0xa3   :  { %v143_v7 = vmul.f32 %v141_v2, %v330_v22  ;;  %159 = vst.msk [vmem:[#allocation2] sm:$0xff] %vm60_vm1, %v156_v3  ;;  %v151_v9 = vmul.f32 %v149_v5, %v147_v4 }
  0xa5   :  { %v145_v8 = vadd.f32 %v143_v7, %v139_v6 }
  0xa7   :  { %v153_v11 = vsub.f32 %v145_v8, %v151_v9 }
  0xa9   :  { %v157_v12 = vadd.f32 %v155_v10, %v153_v11 }
  0xaa   :  { %v164_v13 = vld [vmem:[#allocation2] sm:$0xff] }
  0xab   :  { %160 = vst.msk [vmem:[#allocation2 + $0x8] sm:$0xff] %vm60_vm1, %v157_v12  ;;  %v166_v15 = vsel %vm60_vm1, %v164_v13, 0.0 }
  0xb2   :  { %v165_v14 = vld [vmem:[#allocation2 + $0x8] sm:$0xff] }
  0xb3   :  { %v167_v16 = vsel %vm60_vm1, %v165_v14, 0.0 }
  0xb4   :  { %v168_v17 = vadd.f32 %v167_v16, %v166_v15 }
  0xb6   :  { %169 = vadd.xlane.f32.xlu0 %v168_v17 }
 0x129   :  { %v170_v18 = vpop.xlane.xlu0 %169 }
 0x12a   :  { %v171_v19 = vrot.slane %v170_v18, 4 }
 0x12c   :  { %v172_v20 = vadd.f32 %v171_v19, %v170_v18 }
 0x12e   :  { %v173_v21 = vrot.slane %v172_v20, 2 }
 0x130   :  { %v174_v22 = vadd.f32 %v173_v21, %v172_v20 }
 0x132   :  { %v175_v23 = vrot.slane %v174_v22, 1 }
 0x134   :  { %v176_v24 = vadd.f32 %v175_v23, %v174_v22 }
 0x136   :  { %199 = vpush %v176_v24 }
 0x167   :  { %s200_s24 = spop %199 }
 0x168   :  { %v178_v25 = vstv %s200_s24 }
 0x169   :  { %180 = vst.msk [vmem:[#allocation8] sm:$0x1] %vm179_vm14, %v178_v25 }
 0x16a   :  { %191 = dma.vmem_to_hbm [thread:$0]  %s187_s1, 16, %s189_s23, [#allocation5]  }
 0x16b   :  { %291 = dma.done.wait [#allocation5], 16  }
 0x16c   :  { %292 = vsyncadd [#allocation5], 4294967280 }
 0x16d   :  { %196 = vsyncpa [#allocation4], 1 }
 0x16e   :  { %197 = vsyncpa [#allocation7], 1 }
 0x16f   :  { %198 = vsyncpa [#allocation5], 1 }

</bundles_post_ra>
